<compile_context>
chip_gen: v7x
topology: tpu7x:2x2x1
jax: 0.10.0
libtpu: 0.0.40
codegen_flags: <defaults>
</compile_context>

<pallas_src>
import jax
import jax.numpy as jnp
from jax.experimental import pallas as pl
from jax.experimental.pallas import tpu as pltpu

LANE = 128        # vreg lane width   (last-dim grain)
SUBLANE = 8       # vreg sublane width for f32 (second-to-last-dim grain)
H_TILE_DEFAULT = 1024   # default cap on the streamed h_main tile (lanes)


def _round_up(n, m):
    return ((n + m - 1) // m) * m


def _pad2(a, rows, cols):
    r, c = a.shape
    return jnp.pad(a, ((0, rows - r), (0, cols - c)))


# ----------------------------------------------------------------------------
# Kernel
# ----------------------------------------------------------------------------
def nmnet_kernel(x_ref,
                 w1_ref, b1_ref, w2_ref, b2_ref,     # nm_net params (resident)
                 w3_ref, b3_ref,                     # main hidden (h-tiled, N)
                 w4_ref,                             # main out    (h-tiled, K)
                 b4_ref,                             # resident
                 y_ref,
                 xmod_ref, acc_ref):                 # VMEM scratch
    j = pl.program_id(1)

    # First h-tile of this batch tile: run nm_net, gate x, zero the accumulator.
    @pl.when(j == 0)
    def _():
        x = x_ref[...]                               # f32 (tb, d_in_p)
        mxu = w1_ref.dtype                           # f32 or bf16 MXU inputs
        # nm_net: Linear -> Tanh -> Linear -> Sigmoid (forward hook => nmdict['nm'])
        h_nm = jnp.tanh(
            jnp.dot(x.astype(mxu), w1_ref[...],
                    preferred_element_type=jnp.float32) + b1_ref[...])
        nm_signal = jax.nn.sigmoid(
            jnp.dot(h_nm.astype(mxu), w2_ref[...],
                    preferred_element_type=jnp.float32) + b2_ref[...])
        # main_net forward_pre_hook: NmLinear.apply_nm_signal(x, nm) = x * nm
        xmod_ref[...] = (x * nm_signal).astype(xmod_ref.dtype)
        acc_ref[...] = jnp.zeros_like(acc_ref)

    # main_net: NmLinear -> ReLU on this h chunk, accumulate the final Linear.
    h = jnp.maximum(
        jnp.dot(xmod_ref[...], w3_ref[...],
                preferred_element_type=jnp.float32) + b3_ref[...],
        0.0)
    acc_ref[...] += jnp.dot(h.astype(w4_ref.dtype), w4_ref[...],
                            preferred_element_type=jnp.float32)

    # Last h-tile: add the output bias and write back (lane-dense store).
    @pl.when(j == pl.num_programs(1) - 1)
    def _():
        y_ref[...] = (acc_ref[...] + b4_ref[...]).astype(y_ref.dtype)


# ----------------------------------------------------------------------------
# One-time parameter preparation (padding + MXU dtype cast) -- NOT per call.
# ----------------------------------------------------------------------------
def prepare_params(params, *, mxu_dtype=jnp.float32, h_tile=None):
    """Pad all feature dims to 128-lane multiples, cast matmul weights to the
    MXU dtype (bf16 recommended on v6e/v7x; keep f32 for strict tolerances),
    and record the padded geometry. Call once, reuse across forward calls."""
    d_in, h_nm = params["w1"].shape
    h_main = params["w3"].shape[1]
    d_out = params["w4"].shape[1]

    d_in_p = _round_up(d_in, LANE)
    h_nm_p = _round_up(h_nm, LANE)
    d_out_p = _round_up(d_out, LANE)

    h_mn_p = _round_up(h_main, LANE)
    if h_tile is None:
        h_tile = min(h_mn_p, H_TILE_DEFAULT)
    h_tile = _round_up(h_tile, LANE)
    h_mn_pp = _round_up(h_mn_p, h_tile)          # pad h_main up to a tile multiple

    wdt = mxu_dtype
    return {
        # matmul weights in MXU dtype, biases kept f32 (elementwise path is f32)
        "w1": _pad2(params["w1"], d_in_p, h_nm_p).astype(wdt),
        "b1": _pad2(params["b1"], 1, h_nm_p).astype(jnp.float32),
        "w2": _pad2(params["w2"], h_nm_p, d_in_p).astype(wdt),
        "b2": _pad2(params["b2"], 1, d_in_p).astype(jnp.float32),
        "w3": _pad2(params["w3"], d_in_p, h_mn_pp).astype(wdt),
        "b3": _pad2(params["b3"], 1, h_mn_pp).astype(jnp.float32),
        "w4": _pad2(params["w4"], h_mn_pp, d_out_p).astype(wdt),
        "b4": _pad2(params["b4"], 1, d_out_p).astype(jnp.float32),
        "dims": dict(d_in=d_in, d_out=d_out, d_in_p=d_in_p, h_nm_p=h_nm_p,
                     h_mn_pp=h_mn_pp, h_tile=h_tile, d_out_p=d_out_p,
                     mxu_dtype=wdt),
    }


def _vmem_limit_bytes(tb, d_in_p, h_nm_p, h_tile, d_out_p, w_bytes):
    # Single-buffered residents + double-buffered streamed tiles + scratch
    # + activation headroom, with 2x margin; clamp to [32 MiB, 128 MiB].
    resident = (2 * d_in_p * h_nm_p) * w_bytes + (h_nm_p + d_in_p + d_out_p) * 4
    streamed = 2 * (tb * d_in_p * 4              # x tile
                    + d_in_p * h_tile * w_bytes  # w3 tile
                    + h_tile * 4                 # b3 tile
                    + h_tile * d_out_p * w_bytes # w4 tile
                    + tb * d_out_p * 4)          # y tile
    scratch = tb * d_in_p * w_bytes + tb * d_out_p * 4
    activ = 2 * tb * (h_nm_p + d_in_p + h_tile + d_out_p) * 4
    need = resident + streamed + scratch + activ
    return int(min(max(2 * need, 32 << 20), 128 << 20))


# ----------------------------------------------------------------------------
# Forward wrapper (per call: only x is padded)
# ----------------------------------------------------------------------------
def nmnet_forward(x, prepped, *, batch_tile=256):
    d = prepped["dims"]
    d_in, d_out = d["d_in"], d["d_out"]
    d_in_p, h_nm_p = d["d_in_p"], d["h_nm_p"]
    h_mn_pp, h_tile, d_out_p = d["h_mn_pp"], d["h_tile"], d["d_out_p"]
    mxu_dtype = d["mxu_dtype"]

    B = x.shape[0]
    assert x.shape[1] == d_in

    # Batch tiling: multiple of 8 sublanes; 256 default fills the 256-wide MXU
    # on v6e/v7x and is also fine on v5e (fewer grid steps, better reuse).
    batch_tile = max(SUBLANE, _round_up(int(batch_tile), SUBLANE))
    b8 = _round_up(B, SUBLANE)
    tb = b8 if b8 <= batch_tile else batch_tile
    b_p = _round_up(b8, tb)
    nb = b_p // tb
    nh = h_mn_pp // h_tile
    grid = (nb, nh)

    xp = x.astype(jnp.float32)
    if (b_p, d_in_p) != (B, d_in):
        xp = jnp.pad(xp, ((0, b_p - B), (0, d_in_p - d_in)))

    def resident(shape):
        # Constant index_map + single buffering: fetched once, half the VMEM.
        return pl.BlockSpec(shape, lambda i, j: (0, 0),
                            pipeline_mode=pl.Buffered(1))

    in_specs = [
        pl.BlockSpec((tb, d_in_p), lambda i, j: (i, 0)),        # x  (batch-tiled)
        resident((d_in_p, h_nm_p)), resident((1, h_nm_p)),      # w1, b1
        resident((h_nm_p, d_in_p)), resident((1, d_in_p)),      # w2, b2
        pl.BlockSpec((d_in_p, h_tile), lambda i, j: (0, j)),    # w3 (h-tiled, N)
        pl.BlockSpec((1, h_tile), lambda i, j: (0, j)),         # b3 (h-tiled)
        pl.BlockSpec((h_tile, d_out_p), lambda i, j: (j, 0)),   # w4 (h-tiled, K)
        resident((1, d_out_p)),                                 # b4
    ]
    out_spec = pl.BlockSpec((tb, d_out_p), lambda i, j: (i, 0))

    w_bytes = jnp.dtype(mxu_dtype).itemsize
    vmem_limit = _vmem_limit_bytes(tb, d_in_p, h_nm_p, h_tile, d_out_p, w_bytes)

    flops = 2 * b_p * (d_in_p * h_nm_p + h_nm_p * d_in_p
                       + d_in_p * h_mn_pp + h_mn_pp * d_out_p)
    transcendentals = b_p * (h_nm_p + d_in_p)          # tanh + sigmoid
    weight_keys = ("w1", "b1", "w2", "b2", "w3", "b3", "w4", "b4")
    bytes_accessed = (xp.size * 4 + b_p * d_out_p * 4
                      + sum(prepped[k].size * jnp.dtype(prepped[k].dtype).itemsize
                            for k in weight_keys))

    y_pad = pl.pallas_call(
        nmnet_kernel,
        out_shape=jax.ShapeDtypeStruct((b_p, d_out_p), jnp.float32),
        grid=grid,
        in_specs=in_specs,
        out_specs=out_spec,
        scratch_shapes=[
            pltpu.VMEM((tb, d_in_p), mxu_dtype),     # x * nm_signal, reused per h tile
            pltpu.VMEM((tb, d_out_p), jnp.float32),  # output accumulator
        ],
        compiler_params=pltpu.CompilerParams(
            dimension_semantics=("parallel", "arbitrary"),   # megacore on batch
            vmem_limit_bytes=vmem_limit),
        cost_estimate=pl.CostEstimate(
            flops=flops,
            transcendentals=transcendentals,
            bytes_accessed=bytes_accessed),
    )(xp, prepped["w1"], prepped["b1"], prepped["w2"], prepped["b2"],
      prepped["w3"], prepped["b3"], prepped["w4"], prepped["b4"])

    if (b_p, d_out_p) == (B, d_out):
        return y_pad                                  # skip the un-pad HBM round trip
    return y_pad[:B, :d_out]


# ----------------------------------------------------------------------------
# Pure-JAX reference mirroring the PyTorch hook semantics.
# ----------------------------------------------------------------------------
def nmnet_reference(x, p):
    h_nm = jnp.tanh(x @ p["w1"] + p["b1"])
    sig = jax.nn.sigmoid(h_nm @ p["w2"] + p["b2"])     # nmdict['nm']
    h = jnp.maximum((x * sig) @ p["w3"] + p["b3"], 0.0)
    return h @ p["w4"] + p["b4"]


def init_params(key, d_in, h_nm, h_main, d_out):
    ks = jax.random.split(key, 8)
    def lin(kw, fan_in, fan_out):
        bound = 1.0 / jnp.sqrt(fan_in)
        return jax.random.uniform(kw, (fan_in, fan_out), jnp.float32, -bound, bound)
    def bias(kb, fan_in, fan_out):
        bound = 1.0 / jnp.sqrt(fan_in)
        return jax.random.uniform(kb, (1, fan_out), jnp.float32, -bound, bound)
    return {
        "w1": lin(ks[0], d_in, h_nm),    "b1": bias(ks[1], d_in, h_nm),
        "w2": lin(ks[2], h_nm, d_in),    "b2": bias(ks[3], h_nm, d_in),
        "w3": lin(ks[4], d_in, h_main),  "b3": bias(ks[5], d_in, h_main),
        "w4": lin(ks[6], h_main, d_out), "b4": bias(ks[7], h_main, d_out),
    }


if __name__ == "__main__":
    B, D_IN, H_NM, H_MAIN, D_OUT = 8, 32, 64, 64, 16

    key = jax.random.PRNGKey(0)
    kx, kp = jax.random.split(key)
    x = jax.random.normal(kx, (B, D_IN), dtype=jnp.float32)
    params = init_params(kp, D_IN, H_NM, H_MAIN, D_OUT)

    y_ref = nmnet_reference(x, params)

    # f32 MXU path (strict tolerance) -- preferred on v5e.
    prepped_f32 = prepare_params(params)               # padding/cast hoisted, once
    y = nmnet_forward(x, prepped_f32)
    jax.block_until_ready(y)
    assert y.shape == (B, D_OUT)
    assert jnp.allclose(y, y_ref, atol=1e-5, rtol=1e-5)

    # bf16 MXU inputs (fast path on v6e/v7x: 2x MXU throughput, half the
    # resident-weight VMEM); elementwise math and accumulation stay f32.
    prepped_bf16 = prepare_params(params, mxu_dtype=jnp.bfloat16)
    y_bf16 = nmnet_forward(x, prepped_bf16)
    jax.block_until_ready(y_bf16)
    assert y_bf16.shape == (B, D_OUT)
    assert jnp.allclose(y_bf16, y_ref, atol=5e-2, rtol=5e-2)

    print("KERNEL_OK")
</pallas_src>

<mosaic_0001>
module attributes {stable_mosaic.version = 11 : i64} {
  func.func @nmnet_kernel(%arg0: i32, %arg1: i32, %arg2: memref<8x128xf32, #tpu.memory_space<vmem>>, %arg3: memref<128x128xf32, #tpu.memory_space<vmem>>, %arg4: memref<1x128xf32, #tpu.memory_space<vmem>>, %arg5: memref<128x128xf32, #tpu.memory_space<vmem>>, %arg6: memref<1x128xf32, #tpu.memory_space<vmem>>, %arg7: memref<128x128xf32, #tpu.memory_space<vmem>>, %arg8: memref<1x128xf32, #tpu.memory_space<vmem>>, %arg9: memref<128x128xf32, #tpu.memory_space<vmem>>, %arg10: memref<1x128xf32, #tpu.memory_space<vmem>>, %arg11: memref<8x128xf32, #tpu.memory_space<vmem>>, %arg12: memref<8x128xf32, #tpu.memory_space<vmem>>, %arg13: memref<8x128xf32, #tpu.memory_space<vmem>>) attributes {dimension_semantics = [#tpu.dimension_semantics<parallel>, #tpu.dimension_semantics<arbitrary>], iteration_bounds = array<i64: 1, 1>, scalar_prefetch = 0 : i64, scratch_operands = 2 : i64, tpu.core_type = #tpu.core_type<tc>, window_params = [{transform_indices = @transform_0, window_bounds = array<i64: 8, 128>}, {pipeline_mode = #tpu.pipeline_mode<synchronous>, transform_indices = @transform_1, window_bounds = array<i64: 128, 128>}, {pipeline_mode = #tpu.pipeline_mode<synchronous>, transform_indices = @transform_2, window_bounds = array<i64: 1, 128>}, {pipeline_mode = #tpu.pipeline_mode<synchronous>, transform_indices = @transform_3, window_bounds = array<i64: 128, 128>}, {pipeline_mode = #tpu.pipeline_mode<synchronous>, transform_indices = @transform_4, window_bounds = array<i64: 1, 128>}, {transform_indices = @transform_5, window_bounds = array<i64: 128, 128>}, {transform_indices = @transform_6, window_bounds = array<i64: 1, 128>}, {transform_indices = @transform_7, window_bounds = array<i64: 128, 128>}, {pipeline_mode = #tpu.pipeline_mode<synchronous>, transform_indices = @transform_8, window_bounds = array<i64: 1, 128>}, {transform_indices = @transform_9, window_bounds = array<i64: 8, 128>}]} {
    %c0_i32 = arith.constant 0 : i32
    %0 = arith.cmpi eq, %arg1, %c0_i32 : i32
    %1 = arith.extui %0 : i1 to i32
    %c0_i32_0 = arith.constant 0 : i32
    %2 = arith.cmpi ne, %1, %c0_i32_0 : i32
    scf.if %2 {
      %c0_16 = arith.constant 0 : index
      %c0_17 = arith.constant 0 : index
      %19 = vector.load %arg2[%c0_16, %c0_17] : memref<8x128xf32, #tpu.memory_space<vmem>>, vector<8x128xf32>
      %c0_18 = arith.constant 0 : index
      %c0_19 = arith.constant 0 : index
      %20 = vector.load %arg3[%c0_18, %c0_19] : memref<128x128xf32, #tpu.memory_space<vmem>>, vector<128x128xf32>
      %cst_20 = arith.constant dense<0.000000e+00> : vector<8x128xf32>
      %21 = tpu.matmul %19, %20, %cst_20 {dimension_numbers = #tpu.dot_dimension_numbers<[1], [0], [0], [1], [0, 0, 1, 1], [], []>} : vector<8x128xf32>, vector<128x128xf32>, vector<8x128xf32> -> vector<8x128xf32>
      %c0_21 = arith.constant 0 : index
      %c0_22 = arith.constant 0 : index
      %22 = vector.load %arg4[%c0_21, %c0_22] : memref<1x128xf32, #tpu.memory_space<vmem>>, vector<1x128xf32>
      %23 = vector.broadcast %22 : vector<1x128xf32> to vector<8x128xf32>
      %24 = arith.addf %21, %23 : vector<8x128xf32>
      %25 = math.tanh %24 : vector<8x128xf32>
      %c0_23 = arith.constant 0 : index
      %c0_24 = arith.constant 0 : index
      %26 = vector.load %arg5[%c0_23, %c0_24] : memref<128x128xf32, #tpu.memory_space<vmem>>, vector<128x128xf32>
      %cst_25 = arith.constant dense<0.000000e+00> : vector<8x128xf32>
      %27 = tpu.matmul %25, %26, %cst_25 {dimension_numbers = #tpu.dot_dimension_numbers<[1], [0], [0], [1], [0, 0, 1, 1], [], []>} : vector<8x128xf32>, vector<128x128xf32>, vector<8x128xf32> -> vector<8x128xf32>
      %c0_26 = arith.constant 0 : index
      %c0_27 = arith.constant 0 : index
      %28 = vector.load %arg6[%c0_26, %c0_27] : memref<1x128xf32, #tpu.memory_space<vmem>>, vector<1x128xf32>
      %29 = vector.broadcast %28 : vector<1x128xf32> to vector<8x128xf32>
      %30 = arith.addf %27, %29 : vector<8x128xf32>
      %31 = arith.negf %30 : vector<8x128xf32>
      %32 = math.exp %31 : vector<8x128xf32>
      %cst_28 = arith.constant 1.000000e+00 : f32
      %33 = vector.broadcast %cst_28 : f32 to vector<8x128xf32>
      %34 = arith.addf %33, %32 : vector<8x128xf32>
      %35 = arith.divf %33, %34 : vector<8x128xf32>
      %36 = arith.mulf %19, %35 : vector<8x128xf32>
      %c0_29 = arith.constant 0 : index
      %c0_30 = arith.constant 0 : index
      %37 = vector.load %arg12[%c0_29, %c0_30] : memref<8x128xf32, #tpu.memory_space<vmem>>, vector<8x128xf32>
      tpu.vector_store %arg12[%c0_29, %c0_30], %36 {strides = array<i32>} : memref<8x128xf32, #tpu.memory_space<vmem>>, vector<8x128xf32>,
      %cst_31 = arith.constant 0.000000e+00 : f32
      %38 = vector.broadcast %cst_31 : f32 to vector<8x128xf32>
      %c0_32 = arith.constant 0 : index
      %c0_33 = arith.constant 0 : index
      %39 = vector.load %arg13[%c0_32, %c0_33] : memref<8x128xf32, #tpu.memory_space<vmem>>, vector<8x128xf32>
      tpu.vector_store %arg13[%c0_32, %c0_33], %38 {strides = array<i32>} : memref<8x128xf32, #tpu.memory_space<vmem>>, vector<8x128xf32>,
    } else {
    }
    %c0 = arith.constant 0 : index
    %c0_1 = arith.constant 0 : index
    %3 = vector.load %arg12[%c0, %c0_1] : memref<8x128xf32, #tpu.memory_space<vmem>>, vector<8x128xf32>
    %c0_2 = arith.constant 0 : index
    %c0_3 = arith.constant 0 : index
    %4 = vector.load %arg7[%c0_2, %c0_3] : memref<128x128xf32, #tpu.memory_space<vmem>>, vector<128x128xf32>
    %cst = arith.constant dense<0.000000e+00> : vector<8x128xf32>
    %5 = tpu.matmul %3, %4, %cst {dimension_numbers = #tpu.dot_dimension_numbers<[1], [0], [0], [1], [0, 0, 1, 1], [], []>} : vector<8x128xf32>, vector<128x128xf32>, vector<8x128xf32> -> vector<8x128xf32>
    %c0_4 = arith.constant 0 : index
    %c0_5 = arith.constant 0 : index
    %6 = vector.load %arg8[%c0_4, %c0_5] : memref<1x128xf32, #tpu.memory_space<vmem>>, vector<1x128xf32>
    %7 = vector.broadcast %6 : vector<1x128xf32> to vector<8x128xf32>
    %8 = arith.addf %5, %7 : vector<8x128xf32>
    %cst_6 = arith.constant 0.000000e+00 : f32
    %9 = vector.broadcast %cst_6 : f32 to vector<8x128xf32>
    %10 = arith.maximumf %8, %9 : vector<8x128xf32>
    %c0_7 = arith.constant 0 : index
    %c0_8 = arith.constant 0 : index
    %11 = vector.load %arg13[%c0_7, %c0_8] : memref<8x128xf32, #tpu.memory_space<vmem>>, vector<8x128xf32>
    %c0_9 = arith.constant 0 : index
    %c0_10 = arith.constant 0 : index
    %12 = vector.load %arg9[%c0_9, %c0_10] : memref<128x128xf32, #tpu.memory_space<vmem>>, vector<128x128xf32>
    %cst_11 = arith.constant dense<0.000000e+00> : vector<8x128xf32>
    %13 = tpu.matmul %10, %12, %cst_11 {dimension_numbers = #tpu.dot_dimension_numbers<[1], [0], [0], [1], [0, 0, 1, 1], [], []>} : vector<8x128xf32>, vector<128x128xf32>, vector<8x128xf32> -> vector<8x128xf32>
    %14 = arith.addf %11, %13 : vector<8x128xf32>
    %c0_12 = arith.constant 0 : index
    %c0_13 = arith.constant 0 : index
    %15 = vector.load %arg13[%c0_12, %c0_13] : memref<8x128xf32, #tpu.memory_space<vmem>>, vector<8x128xf32>
    tpu.vector_store %arg13[%c0_12, %c0_13], %14 {strides = array<i32>} : memref<8x128xf32, #tpu.memory_space<vmem>>, vector<8x128xf32>,
    %c0_i32_14 = arith.constant 0 : i32
    %16 = arith.cmpi eq, %arg1, %c0_i32_14 : i32
    %17 = arith.extui %16 : i1 to i32
    %c0_i32_15 = arith.constant 0 : i32
    %18 = arith.cmpi ne, %17, %c0_i32_15 : i32
    scf.if %18 {
      %c0_16 = arith.constant 0 : index
      %c0_17 = arith.constant 0 : index
      %19 = vector.load %arg13[%c0_16, %c0_17] : memref<8x128xf32, #tpu.memory_space<vmem>>, vector<8x128xf32>
      %c0_18 = arith.constant 0 : index
      %c0_19 = arith.constant 0 : index
      %20 = vector.load %arg10[%c0_18, %c0_19] : memref<1x128xf32, #tpu.memory_space<vmem>>, vector<1x128xf32>
      %21 = vector.broadcast %20 : vector<1x128xf32> to vector<8x128xf32>
      %22 = arith.addf %19, %21 : vector<8x128xf32>
      %c0_20 = arith.constant 0 : index
      %c0_21 = arith.constant 0 : index
      %23 = vector.load %arg11[%c0_20, %c0_21] : memref<8x128xf32, #tpu.memory_space<vmem>>, vector<8x128xf32>
      tpu.vector_store %arg11[%c0_20, %c0_21], %22 {strides = array<i32>} : memref<8x128xf32, #tpu.memory_space<vmem>>, vector<8x128xf32>,
    } else {
    }
    return
  }
  func.func @transform_0(%arg0: i32, %arg1: i32) -> (i32, i32) {
    %c0_i32 = arith.constant 0 : i32
    %c0_i32_0 = arith.constant 0 : i32
    return %arg0, %c0_i32 : i32, i32
  }
  func.func @transform_1(%arg0: i32, %arg1: i32) -> (i32, i32) {
    %c0_i32 = arith.constant 0 : i32
    %c0_i32_0 = arith.constant 0 : i32
    %c0_i32_1 = arith.constant 0 : i32
    return %c0_i32, %c0_i32_0 : i32, i32
  }
  func.func @transform_2(%arg0: i32, %arg1: i32) -> (i32, i32) {
    %c0_i32 = arith.constant 0 : i32
    %c0_i32_0 = arith.constant 0 : i32
    %c0_i32_1 = arith.constant 0 : i32
    return %c0_i32, %c0_i32_0 : i32, i32
  }
  func.func @transform_3(%arg0: i32, %arg1: i32) -> (i32, i32) {
    %c0_i32 = arith.constant 0 : i32
    %c0_i32_0 = arith.constant 0 : i32
    %c0_i32_1 = arith.constant 0 : i32
    return %c0_i32, %c0_i32_0 : i32, i32
  }
  func.func @transform_4(%arg0: i32, %arg1: i32) -> (i32, i32) {
    %c0_i32 = arith.constant 0 : i32
    %c0_i32_0 = arith.constant 0 : i32
    %c0_i32_1 = arith.constant 0 : i32
    return %c0_i32, %c0_i32_0 : i32, i32
  }
  func.func @transform_5(%arg0: i32, %arg1: i32) -> (i32, i32) {
    %c0_i32 = arith.constant 0 : i32
    %c0_i32_0 = arith.constant 0 : i32
    return %c0_i32, %arg1 : i32, i32
  }
  func.func @transform_6(%arg0: i32, %arg1: i32) -> (i32, i32) {
    %c0_i32 = arith.constant 0 : i32
    %c0_i32_0 = arith.constant 0 : i32
    return %c0_i32, %arg1 : i32, i32
  }
  func.func @transform_7(%arg0: i32, %arg1: i32) -> (i32, i32) {
    %c0_i32 = arith.constant 0 : i32
    %c0_i32_0 = arith.constant 0 : i32
    return %arg1, %c0_i32 : i32, i32
  }
  func.func @transform_8(%arg0: i32, %arg1: i32) -> (i32, i32) {
    %c0_i32 = arith.constant 0 : i32
    %c0_i32_0 = arith.constant 0 : i32
    %c0_i32_1 = arith.constant 0 : i32
    return %c0_i32, %c0_i32_0 : i32, i32
  }
  func.func @transform_9(%arg0: i32, %arg1: i32) -> (i32, i32) {
    %c0_i32 = arith.constant 0 : i32
    %c0_i32_0 = arith.constant 0 : i32
    return %arg0, %c0_i32 : i32, i32
  }
}

</mosaic_0001>

<bundles_post_ra>
// kernel: tpu_custom_call.1
= control target key start
LH: loop header
LB: loop body
LE: loop exit
PB: predicated region body
PF: predicated region fallthrough
CT: control target
= control target key end

     0   :  { %14 = vsyncpa [#allocation5], 0  ;;  %s1181_s0 = inlined_call_operand.hbm [shape: f32[8,128], index: 0, kind: input, shape index: {}]   ;;  %s1182_s1 = inlined_call_operand.hbm [shape: f32[128,128], index: 1, kind: input, shape index: {}]   ;;  %s1183_s2 = inlined_call_operand.vmem [shape: f32[1,128], index: 2, kind: input, shape index: {}]   ;;  %s1184_s3 = inlined_call_operand.hbm [shape: f32[128,128], index: 3, kind: input, shape index: {}]   ;;  %s1185_s4 = inlined_call_operand.vmem [shape: f32[1,128], index: 4, kind: input, shape index: {}]   ;;  %s1186_s5 = inlined_call_operand.hbm [shape: f32[128,128], index: 5, kind: input, shape index: {}]   ;;  %s1187_s6 = inlined_call_operand.vmem [shape: f32[1,128], index: 6, kind: input, shape index: {}]   ;;  %s1188_s7 = inlined_call_operand.hbm [shape: f32[128,128], index: 7, kind: input, shape index: {}]   ;;  %s1189_s8 = inlined_call_operand.vmem [shape: f32[1,128], index: 8, kind: input, shape index: {}]   ;;  %s1190_s9 = inlined_call_operand.hbm [shape: f32[8,128], index: 9, kind: output, shape index: {}]  }
   0x1   :  { %15 = vsyncpa [#allocation8], 0 }
   0x2   :  { %16 = vsyncpa [#allocation11], 0 }
   0x3   :  { %17 = vsyncpa [#allocation6], 0  ;;  %s980_s30 = smov [#allocation7]   ;;  %s840_s13 = scalar_lea.hbm %s1182_s1, 2048 }
   0x4   :  { %s33_s10 = sshll.u32 %s980_s30, 4  ;;  %p841_p0 = scmp.ne.s32.totalorder %s1182_s1, %s840_s13  ;;  %s34_s10 = int_to_ptr.vmem [resolvable:$true] %s33_s10 }
   0x5   :  { %p844_p1 = scmp.lt.u32.totalorder %s840_s13, %s1182_s1 }
   0x7   :  { %p846_p2 = pnand %p844_p1, %p841_p0 }
   0x9   :  { %849 = shalt.err (!%p846_p2)
}
   0xa   :  { %s850_s18 = scalar_lea.vmem %s34_s10, 2048  ;;  %p855_p4 = scmp.lt.s32.totalorder %s34_s10, %s34_s10 }
   0xb   :  { %p851_p3 = scmp.ne.s32.totalorder %s34_s10, %s850_s18  ;;  %p856_p5 = scmp.lt.s32.totalorder %s850_s18, %s850_s18 }
   0xd   :  { %p857_p6 = por %p856_p5, %p855_p4 }
   0xf   :  { %p858_p7 = pnand %p857_p6, %p851_p3 }
  0x11   :  { %861 = shalt.err (!%p858_p7)
}
  0x12   :  { %s981_s19 = smov 128   ;;  %s982_s20 = smov 8  }
  0x13   :  { %39 = dma.hbm_to_vmem [thread:$0]  %s1182_s1, 2048, %s34_s10, [#allocation8], %s981_s19, %s981_s19, %s982_s20  }
  0x14   :  { %s983_s23 = smov [#allocation10]   ;;  %s984_s25 = smov [#allocation4]  }
  0x15   :  { %s61_s24 = sshll.u32 %s983_s23, 4  ;;  %s24_s26 = sshll.u32 %s984_s25, 4  ;;  %s62_s24 = int_to_ptr.vmem [resolvable:$true] %s61_s24  ;;  %s25_s26 = int_to_ptr.vmem [resolvable:$true] %s24_s26 }
  0x16   :  { %s862_s29 = scalar_lea.hbm %s1186_s5, 2048 }
  0x17   :  { %p863_p8 = scmp.ne.s32.totalorder %s1186_s5, %s862_s29  ;;  %p866_p9 = scmp.lt.u32.totalorder %s862_s29, %s1186_s5 }
  0x19   :  { %p868_p10 = pnand %p866_p9, %p863_p8 }
  0x1b   :  { %871 = shalt.err (!%p868_p10)
}
  0x1c   :  { %s872_s1 = scalar_lea.vmem %s62_s24, 2048  ;;  %p877_p12 = scmp.lt.s32.totalorder %s62_s24, %s62_s24 }
  0x1d   :  { %p873_p11 = scmp.ne.s32.totalorder %s62_s24, %s872_s1  ;;  %p878_p13 = scmp.lt.s32.totalorder %s872_s1, %s872_s1 }
  0x1f   :  { %p879_p0 = por %p878_p13, %p877_p12 }
  0x21   :  { %p880_p1 = pnand %p879_p0, %p873_p11 }
  0x23   :  { %883 = shalt.err (!%p880_p1)
}
  0x24   :  { %67 = dma.hbm_to_vmem [thread:$0]  %s1186_s5, 2048, %s62_s24, [#allocation11], %s981_s19, %s981_s19, %s982_s20  }
  0x25   :  { %s884_s17 = scalar_lea.hbm %s1181_s0, 128 }
  0x26   :  { %p885_p2 = scmp.ne.s32.totalorder %s1181_s0, %s884_s17  ;;  %p888_p3 = scmp.lt.u32.totalorder %s884_s17, %s1181_s0 }
  0x28   :  { %p890_p4 = pnand %p888_p3, %p885_p2 }
  0x2a   :  { %893 = shalt.err (!%p890_p4)
}
  0x2b   :  { %s894_s25 = scalar_lea.vmem %s25_s26, 128  ;;  %p899_p6 = scmp.lt.s32.totalorder %s25_s26, %s25_s26 }
  0x2c   :  { %p895_p5 = scmp.ne.s32.totalorder %s25_s26, %s894_s25  ;;  %p900_p7 = scmp.lt.s32.totalorder %s894_s25, %s894_s25 }
  0x2e   :  { %p901_p8 = por %p900_p7, %p899_p6 }
  0x30   :  { %p902_p9 = pnand %p901_p8, %p895_p5 }
  0x32   :  { %905 = shalt.err (!%p902_p9)
}
  0x33   :  { %27 = dma.hbm_to_vmem [thread:$0]  %s1181_s0, 128, %s25_s26, [#allocation5]  }
  0x34   :  { %s985_s27 = smov [#allocation9]   ;;  %s986_s29 = smov [#allocation12]  }
  0x35   :  { %s47_s28 = sshll.u32 %s985_s27, 4  ;;  %s75_s30 = sshll.u32 %s986_s29, 4  ;;  %s48_s28 = int_to_ptr.vmem [resolvable:$true] %s47_s28  ;;  %s76_s30 = int_to_ptr.vmem [resolvable:$true] %s75_s30 }
  0x36   :  { %s906_s13 = scalar_lea.hbm %s1184_s3, 2048 }
  0x37   :  { %p907_p10 = scmp.ne.s32.totalorder %s1184_s3, %s906_s13  ;;  %p910_p11 = scmp.lt.u32.totalorder %s906_s13, %s1184_s3 }
  0x39   :  { %p912_p12 = pnand %p910_p11, %p907_p10 }
  0x3b   :  { %915 = shalt.err (!%p912_p12)
}
  0x3c   :  { %s916_s0 = scalar_lea.vmem %s48_s28, 2048  ;;  %p921_p0 = scmp.lt.s32.totalorder %s48_s28, %s48_s28 }
  0x3d   :  { %p917_p13 = scmp.ne.s32.totalorder %s48_s28, %s916_s0  ;;  %p922_p1 = scmp.lt.s32.totalorder %s916_s0, %s916_s0 }
  0x3f   :  { %p923_p2 = por %p922_p1, %p921_p0 }
  0x41   :  { %p924_p3 = pnand %p923_p2, %p917_p13 }
  0x43   :  { %927 = shalt.err (!%p924_p3)
}
  0x44   :  { %53 = dma.hbm_to_vmem [thread:$0]  %s1184_s3, 2048, %s48_s28, [#allocation8], %s981_s19, %s981_s19, %s982_s20  }
  0x45   :  { %s928_s21 = scalar_lea.hbm %s1188_s7, 2048 }
  0x46   :  { %p929_p4 = scmp.ne.s32.totalorder %s1188_s7, %s928_s21  ;;  %p932_p5 = scmp.lt.u32.totalorder %s928_s21, %s1188_s7 }
  0x48   :  { %p934_p6 = pnand %p932_p5, %p929_p4 }
  0x4a   :  { %937 = shalt.err (!%p934_p6)
}
  0x4b   :  { %s938_s24 = scalar_lea.vmem %s76_s30, 2048  ;;  %p943_p8 = scmp.lt.s32.totalorder %s76_s30, %s76_s30 }
  0x4c   :  { %p939_p7 = scmp.ne.s32.totalorder %s76_s30, %s938_s24  ;;  %p944_p9 = scmp.lt.s32.totalorder %s938_s24, %s938_s24 }
  0x4e   :  { %p945_p10 = por %p944_p9, %p943_p8 }
  0x50   :  { %p946_p11 = pnand %p945_p10, %p939_p7 }
  0x52   :  { %949 = shalt.err (!%p946_p11)
}
  0x53   :  { %81 = dma.hbm_to_vmem [thread:$0]  %s1188_s7, 2048, %s76_s30, [#allocation11], %s981_s19, %s981_s19, %s982_s20  }
  0x54   :  { %972 = dma.done.wait [#allocation5], 128  }
  0x55   :  { %973 = vsyncadd [#allocation5], 4294967168 }
  0x56   :  { %974 = dma.done.wait [#allocation8], 4096  }
  0x57   :  { %975 = vsyncadd [#allocation8], 4294963200 }
  0x58   :  { %976 = dma.done.wait [#allocation11], 4096  }
  0x59   :  { %977 = vsyncadd [#allocation11], 4294963200  ;;  %v987_v0 = vmov 0.0|0.0   ;;  %vm988_vm0 = vmmov 0   ;;  %v989_v1 = vmov 0.0   ;;  %v104_v2 = vld [vmem:[#allocation7] sm:$0xff] }
  0x5a   :  { %727 = vmatprep.subr.bf16.mxu0 %v987_v0  ;;  %619 = vmatprep.mubr.msk.f32.mxu0 %vm988_vm0, %v989_v1  ;;  %v105_v3 = vld [vmem:[#allocation7 + $0x8] sm:$0xff]  ;;  %v106_v4 = vld [vmem:[#allocation7 + $0x10] sm:$0xff]  ;;  %v107_v6 = vld [vmem:[#allocation7 + $0x18] sm:$0xff]  ;;  %s990_s11 = smov [#allocation13]  }
  0x5b   :  { %751 = vmatprep.subr.bf16.mxu1 %v987_v0  ;;  %654 = vmatprep.mubr.msk.f32.mxu1 %vm988_vm0, %v989_v1  ;;  %v728_v5 = vpack.c.bf16 %v105_v3, %v104_v2  ;;  %v731_v7 = vpack.c.bf16 %v107_v6, %v106_v4  ;;  %v108_v8 = vld [vmem:[#allocation7 + $0x20] sm:$0xff]  ;;  %v109_v9 = vld [vmem:[#allocation7 + $0x28] sm:$0xff]  ;;  %v200_v12 = vld [vmem:[#allocation9 + $0x10] sm:$0xff]  ;;  %s503_s12 = sshll.u32 %s990_s11, 4  ;;  %s504_s12 = int_to_ptr.vmem [resolvable:$true] %s503_s12 }
  0x5c   :  { %v198_v10 = vld [vmem:[#allocation9] sm:$0xff]  ;;  %v199_v11 = vld [vmem:[#allocation9 + $0x8] sm:$0xff]  ;;  %v201_v13 = vld [vmem:[#allocation9 + $0x18] sm:$0xff]  ;;  %v734_v14 = vpack.c.bf16 %v109_v9, %v108_v8  ;;  %s950_s13 = scalar_lea.vmem %s504_s12, 128  ;;  %p955_p13 = scmp.lt.s32.totalorder %s504_s12, %s504_s12 }
  0x5d   :  { %729 = vmatpush3.bf16.msra.mxu0 %v728_v5  ;;  %v752_v15 = vpack.c.bf16 %v199_v11, %v198_v10  ;;  %v110_v16 = vld [vmem:[#allocation7 + $0x30] sm:$0xff]  ;;  %v111_v17 = vld [vmem:[#allocation7 + $0x38] sm:$0xff]  ;;  %v755_v18 = vpack.c.bf16 %v201_v13, %v200_v12  ;;  %v202_v19 = vld [vmem:[#allocation9 + $0x20] sm:$0xff]  ;;  %p951_p12 = scmp.ne.s32.totalorder %s504_s12, %s950_s13  ;;  %p956_p0 = scmp.lt.s32.totalorder %s950_s13, %s950_s13 }
  0x5e   :  { %730 = vmatprep.subr.bf16.mxu0 %v987_v0  ;;  %v203_v20 = vld [vmem:[#allocation9 + $0x28] sm:$0xff]  ;;  %v737_v21 = vpack.c.bf16 %v111_v17, %v110_v16  ;;  %v112_v22 = vld [vmem:[#allocation7 + $0x40] sm:$0xff]  ;;  %v204_v25 = vld [vmem:[#allocation9 + $0x30] sm:$0xff] }
  0x5f   :  { %753 = vmatpush3.bf16.msra.mxu1 %v752_v15  ;;  %v113_v23 = vld [vmem:[#allocation7 + $0x48] sm:$0xff]  ;;  %v758_v24 = vpack.c.bf16 %v203_v20, %v202_v19  ;;  %v205_v26 = vld [vmem:[#allocation9 + $0x38] sm:$0xff]  ;;  %v114_v28 = vld [vmem:[#allocation7 + $0x50] sm:$0xff]  ;;  %p957_p1 = por %p956_p0, %p955_p13 }
  0x60   :  { %754 = vmatprep.subr.bf16.mxu1 %v987_v0  ;;  %v740_v27 = vpack.c.bf16 %v113_v23, %v112_v22  ;;  %v115_v29 = vld [vmem:[#allocation7 + $0x58] sm:$0xff]  ;;  %v761_v30 = vpack.c.bf16 %v205_v26, %v204_v25  ;;  %v206_v31 = vld [vmem:[#allocation9 + $0x40] sm:$0xff]  ;;  %v207_v32 = vld [vmem:[#allocation9 + $0x48] sm:$0xff] }
  0x61   :  { %732 = vmatpush3.bf16.msra.mxu0 %v731_v7  ;;  %v743_v33 = vpack.c.bf16 %v115_v29, %v114_v28  ;;  %v116_v34 = vld [vmem:[#allocation7 + $0x60] sm:$0xff]  ;;  %v117_v35 = vld [vmem:[#allocation7 + $0x68] sm:$0xff]  ;;  %v764_v36 = vpack.c.bf16 %v207_v32, %v206_v31  ;;  %v118_v38 = vld [vmem:[#allocation7 + $0x70] sm:$0xff]  ;;  %p958_p2 = pnand %p957_p1, %p951_p12 }
  0x62   :  { %733 = vmatprep.subr.bf16.mxu0 %v987_v0  ;;  %v746_v37 = vpack.c.bf16 %v117_v35, %v116_v34  ;;  %v119_v39 = vld [vmem:[#allocation7 + $0x78] sm:$0xff]  ;;  %v208_v42 = vld [vmem:[#allocation9 + $0x50] sm:$0xff]  ;;  %v210_v45 = vld [vmem:[#allocation9 + $0x60] sm:$0xff] }
  0x63   :  { %756 = vmatpush3.bf16.msra.mxu1 %v755_v18  ;;  %v749_v40 = vpack.c.bf16 %v119_v39, %v118_v38  ;;  %v1131_v41 = vld [vmem:[#allocation4] sm:$0xff]  ;;  %v211_v46 = vld [vmem:[#allocation9 + $0x68] sm:$0xff]  ;;  %v212_v48 = vld [vmem:[#allocation9 + $0x70] sm:$0xff] }
  0x64   :  { %757 = vmatprep.subr.bf16.mxu1 %v987_v0  ;;  %v209_v43 = vld [vmem:[#allocation9 + $0x58] sm:$0xff]  ;;  %v770_v47 = vpack.c.bf16 %v211_v46, %v210_v45  ;;  %v301_v56 = vld [vmem:[#allocation10] sm:$0xff]  ;;  %v302_v57 = vld [vmem:[#allocation10 + $0x8] sm:$0xff] }
  0x65   :  { %735 = vmatpush3.bf16.msra.mxu0 %v734_v14  ;;  %v767_v44 = vpack.c.bf16 %v209_v43, %v208_v42  ;;  %v213_v49 = vld [vmem:[#allocation9 + $0x78] sm:$0xff]  ;;  %v776_v58 = vpack.c.bf16 %v302_v57, %v301_v56  ;;  %v303_v59 = vld [vmem:[#allocation10 + $0x10] sm:$0xff]  ;;  %v305_v62 = vld [vmem:[#allocation10 + $0x20] sm:$0xff] }
  0x66   :  { %736 = vmatprep.subr.bf16.mxu0 %v987_v0  ;;  %v773_v50 = vpack.c.bf16 %v213_v49, %v212_v48  ;;  %v514_v51 = vld [vmem:[%s1183_s2] ss:$0 sm:$0xff]  ;;  %v306_v63 = vld [vmem:[#allocation10 + $0x28] sm:$0xff]  ;;  %v307_v3 = vld [vmem:[#allocation10 + $0x30] sm:$0xff] }
  0x67   :  { %759 = vmatpush3.bf16.msra.mxu1 %v758_v24  ;;  %v304_v60 = vld [vmem:[#allocation10 + $0x18] sm:$0xff]  ;;  %v782_v2 = vpack.c.bf16 %v306_v63, %v305_v62  ;;  %v309_v5 = vld [vmem:[#allocation10 + $0x40] sm:$0xff]  ;;  %v310_v6 = vld [vmem:[#allocation10 + $0x48] sm:$0xff] }
  0x68   :  { %760 = vmatprep.subr.bf16.mxu1 %v987_v0  ;;  %v779_v61 = vpack.c.bf16 %v304_v60, %v303_v59  ;;  %v788_v7 = vpack.c.bf16 %v310_v6, %v309_v5  ;;  %v311_v8 = vld [vmem:[#allocation10 + $0x50] sm:$0xff]  ;;  %v312_v9 = vld [vmem:[#allocation10 + $0x58] sm:$0xff]  ;;  %v313_v11 = vld [vmem:[#allocation10 + $0x60] sm:$0xff] }
  0x69   :  { %738 = vmatpush3.bf16.msra.mxu0 %v737_v21  ;;  %v791_v10 = vpack.c.bf16 %v312_v9, %v311_v8  ;;  %v314_v12 = vld [vmem:[#allocation10 + $0x68] sm:$0xff]  ;;  %v315_v14 = vld [vmem:[#allocation10 + $0x70] sm:$0xff]  ;;  %v316_v15 = vld [vmem:[#allocation10 + $0x78] sm:$0xff] }
  0x6a   :  { %739 = vmatprep.subr.bf16.mxu0 %v987_v0  ;;  %v794_v13 = vpack.c.bf16 %v314_v12, %v313_v11  ;;  %v797_v16 = vpack.c.bf16 %v316_v15, %v315_v14  ;;  %v396_v17 = vld [vmem:[#allocation12] sm:$0xff]  ;;  %v397_v18 = vld [vmem:[#allocation12 + $0x8] sm:$0xff]  ;;  %v398_v19 = vld [vmem:[#allocation12 + $0x10] sm:$0xff] }
  0x6b   :  { %762 = vmatpush3.bf16.msra.mxu1 %v761_v30  ;;  %v800_v20 = vpack.c.bf16 %v397_v18, %v396_v17  ;;  %v399_v21 = vld [vmem:[#allocation12 + $0x18] sm:$0xff]  ;;  %v400_v23 = vld [vmem:[#allocation12 + $0x20] sm:$0xff]  ;;  %v401_v24 = vld [vmem:[#allocation12 + $0x28] sm:$0xff] }
  0x6c   :  { %763 = vmatprep.subr.bf16.mxu1 %v987_v0  ;;  %v803_v22 = vpack.c.bf16 %v399_v21, %v398_v19  ;;  %v806_v25 = vpack.c.bf16 %v401_v24, %v400_v23  ;;  %v402_v26 = vld [vmem:[#allocation12 + $0x30] sm:$0xff]  ;;  %v404_v29 = vld [vmem:[#allocation12 + $0x40] sm:$0xff]  ;;  %v405_v30 = vld [vmem:[#allocation12 + $0x48] sm:$0xff] }
  0x6d   :  { %741 = vmatpush3.bf16.msra.mxu0 %v740_v27  ;;  %v403_v27 = vld [vmem:[#allocation12 + $0x38] sm:$0xff]  ;;  %v812_v31 = vpack.c.bf16 %v405_v30, %v404_v29  ;;  %v406_v32 = vld [vmem:[#allocation12 + $0x50] sm:$0xff]  ;;  %v408_v35 = vld [vmem:[#allocation12 + $0x60] sm:$0xff] }
  0x6e   :  { %742 = vmatprep.subr.bf16.mxu0 %v987_v0  ;;  %v809_v28 = vpack.c.bf16 %v403_v27, %v402_v26  ;;  %v515_v38 = vld [vmem:[%s1185_s4] ss:$0 sm:$0xff]  ;;  %v410_v48 = vld [vmem:[#allocation12 + $0x70] sm:$0xff] }
  0x6f   :  { %765 = vmatpush3.bf16.msra.mxu1 %v764_v36  ;;  %v409_v36 = vld [vmem:[#allocation12 + $0x68] sm:$0xff]  ;;  %v411_v49 = vld [vmem:[#allocation12 + $0x78] sm:$0xff] }
  0x70   :  { %766 = vmatprep.subr.bf16.mxu1 %v987_v0 }
  0x71   :  { %744 = vmatpush3.bf16.msra.mxu0 %v743_v33  ;;  %v407_v33 = vld [vmem:[#allocation12 + $0x58] sm:$0xff] }
  0x72   :  { %745 = vmatprep.subr.bf16.mxu0 %v987_v0  ;;  %v815_v34 = vpack.c.bf16 %v407_v33, %v406_v32 }
  0x73   :  { %768 = vmatpush3.bf16.msra.mxu1 %v767_v44 }
  0x74   :  { %769 = vmatprep.subr.bf16.mxu1 %v987_v0 }
  0x75   :  { %747 = vmatpush3.bf16.msra.mxu0 %v746_v37  ;;  %v818_v37 = vpack.c.bf16 %v409_v36, %v408_v35 }
  0x76   :  { %748 = vmatprep.subr.bf16.mxu0 %v987_v0 }
  0x77   :  { %771 = vmatpush3.bf16.msra.mxu1 %v770_v47 }
  0x78   :  { %772 = vmatprep.subr.bf16.mxu1 %v987_v0 }
  0x79   :  { %750 = vmatpush3.bf16.msra.mxu0 %v749_v40 }
  0x7a   :  { %775 = vmatprep.subr.bf16.mxu0 %v987_v0 }
  0x7b   :  { %774 = vmatpush3.bf16.msra.mxu1 %v773_v50  ;;  %v821_v50 = vpack.c.bf16 %v411_v49, %v410_v48 }
  0x7c   :  { %620 = vmatmul.mubr.f32.vlgmr.msra.gmra.mrb[0].mxu0 %v1131_v41  ;;  %799 = vmatprep.subr.bf16.mxu1 %v987_v0 }
  0x7d   :  { %689 = vmatprep.mubr.msk.f32.mxu0 %vm988_vm0, %v989_v1  ;;  %777 = vmatpush3.bf16.msra.mxu0 %v776_v58 }
  0x7e   :  { %778 = vmatprep.subr.bf16.mxu0 %v987_v0 }
  0x81   :  { %780 = vmatpush3.bf16.msra.mxu0 %v779_v61 }
  0x82   :  { %781 = vmatprep.subr.bf16.mxu0 %v987_v0 }
  0x85   :  { %783 = vmatpush3.bf16.msra.mxu0 %v782_v2 }
  0x86   :  { %784 = vmatprep.subr.bf16.mxu0 %v987_v0 }
 0x14f   :  { %v193_v52 = vpop.f32.mrb[0].mxu0 }
 0x150   :  { %v194_v53 = vadd.f32 %v514_v51, %v193_v52  ;;  %v621_v54 = vpop.f32.mrb[1].mxu0 }
 0x152   :  { %834 = vtanh.f32 %v194_v53 }
 0x15c   :  { %v835_v55 = vpop.eup %834 }
 0x15d   :  { %655 = vmatmul.mubr.f32.vlgmr.msra.gmra.mrb[0].mxu1 %v835_v55  ;;  %v518_v55 = vld [vmem:[%s1189_s8] ss:$0 sm:$0xff] }
 0x15e   :  { %724 = vmatprep.mubr.msk.f32.mxu1 %vm988_vm0, %v989_v1  ;;  %v308_v1 = vld [vmem:[#allocation10 + $0x38] sm:$0xff]  ;;  %801 = vmatpush3.bf16.msra.mxu1 %v800_v20 }
 0x15f   :  { %v785_v4 = vpack.c.bf16 %v308_v1, %v307_v3  ;;  %802 = vmatprep.subr.bf16.mxu1 %v987_v0 }
 0x161   :  { %786 = vmatpush3.bf16.msra.mxu0 %v785_v4 }
 0x162   :  { %787 = vmatprep.subr.bf16.mxu0 %v987_v0  ;;  %804 = vmatpush3.bf16.msra.mxu1 %v803_v22 }
 0x163   :  { %805 = vmatprep.subr.bf16.mxu1 %v987_v0 }
 0x165   :  { %789 = vmatpush3.bf16.msra.mxu0 %v788_v7 }
 0x166   :  { %790 = vmatprep.subr.bf16.mxu0 %v987_v0  ;;  %807 = vmatpush3.bf16.msra.mxu1 %v806_v25 }
 0x167   :  { %808 = vmatprep.subr.bf16.mxu1 %v987_v0 }
 0x169   :  { %792 = vmatpush3.bf16.msra.mxu0 %v791_v10 }
 0x16a   :  { %793 = vmatprep.subr.bf16.mxu0 %v987_v0  ;;  %810 = vmatpush3.bf16.msra.mxu1 %v809_v28 }
 0x16b   :  { %811 = vmatprep.subr.bf16.mxu1 %v987_v0 }
 0x16d   :  { %795 = vmatpush3.bf16.msra.mxu0 %v794_v13 }
 0x16e   :  { %796 = vmatprep.subr.bf16.mxu0 %v987_v0  ;;  %813 = vmatpush3.bf16.msra.mxu1 %v812_v31 }
 0x16f   :  { %814 = vmatprep.subr.bf16.mxu1 %v987_v0 }
 0x171   :  { %798 = vmatpush3.bf16.msra.mxu0 %v797_v16 }
 0x172   :  { %816 = vmatpush3.bf16.msra.mxu1 %v815_v34 }
 0x173   :  { %817 = vmatprep.subr.bf16.mxu1 %v987_v0 }
 0x176   :  { %819 = vmatpush3.bf16.msra.mxu1 %v818_v37 }
 0x177   :  { %820 = vmatprep.subr.bf16.mxu1 %v987_v0  ;;  %v517_v0 = vld [vmem:[%s1187_s6] ss:$0 sm:$0xff] }
 0x17a   :  { %822 = vmatpush3.bf16.msra.mxu1 %v821_v50 }
 0x230   :  { %v287_v39 = vpop.f32.mrb[0].mxu1 }
 0x231   :  { %v288_v40 = vadd.f32 %v515_v38, %v287_v39  ;;  %v656_v42 = vpop.f32.mrb[1].mxu1 }
 0x233   :  { %v516_v43 = vmul.f32 -1.442695, %v288_v40 }
 0x235   :  { %836 = vpow2.f32 %v516_v43 }
 0x23f   :  { %v837_v44 = vpop.eup %836 }
 0x240   :  { %v294_v45 = vadd.f32 1.0, %v837_v44 }
 0x242   :  { %838 = vrcp.f32 %v294_v45 }
 0x24c   :  { %v839_v46 = vpop.eup %838 }
 0x24d   :  { %v297_v47 = vmul.f32 %v839_v46, %v1131_v41 }
 0x24f   :  { %690 = vmatmul.mubr.f32.vlgmr.msra.gmra.mrb[2].mxu0 %v297_v47 }
 0x322   :  { %v390_v51 = vpop.f32.mrb[2].mxu0 }
 0x323   :  { %v391_v52 = vadd.f32 %v517_v0, %v390_v51  ;;  %v691_v53 = vpop.f32.mrb[3].mxu0 }
 0x325   :  { %v394_v54 = vmax.f32 %v391_v52, 0.0 }
 0x327   :  { %725 = vmatmul.mubr.f32.vlgmr.msra.gmra.mrb[2].mxu1 %v394_v54 }
 0x3fa   :  { %v478_v41 = vpop.f32.mrb[2].mxu1 }
 0x3fb   :  { %v495_v56 = vadd.f32 %v518_v55, %v478_v41  ;;  %v726_v57 = vpop.f32.mrb[3].mxu1 }
 0x3fd   :  { %496 = vst [vmem:[#allocation13] sm:$0xff] %v495_v56 }
 0x3fe   :  { %961 = shalt.err (!%p958_p2)
}
 0x3ff   :  { %s962_s10 = scalar_lea.hbm %s1190_s9, 128 }
 0x400   :  { %p963_p3 = scmp.ne.s32.totalorder %s1190_s9, %s962_s10  ;;  %p966_p4 = scmp.lt.u32.totalorder %s962_s10, %s1190_s9 }
 0x402   :  { %p968_p5 = pnand %p966_p4, %p963_p3 }
 0x404   :  { %971 = shalt.err (!%p968_p5)
}
 0x405   :  { %506 = dma.vmem_to_hbm [thread:$0]  %s504_s12, 128, %s1190_s9, [#allocation6]  }
 0x406   :  { %978 = dma.done.wait [#allocation6], 128  }
 0x407   :  { %979 = vsyncadd [#allocation6], 4294967168 }
 0x408   :  { %510 = vsyncpa [#allocation5], 1 }
 0x409   :  { %511 = vsyncpa [#allocation8], 1 }
 0x40a   :  { %512 = vsyncpa [#allocation11], 1 }
 0x40b   :  { %513 = vsyncpa [#allocation6], 1 }

</bundles_post_ra>
